<compile_context>
chip_gen: v7x
topology: tpu7x:2x2x1
jax: 0.10.0
libtpu: 0.0.40
codegen_flags: <defaults>
</compile_context>

<pallas_src>
import functools
import math

import jax
import jax.numpy as jnp
from jax.experimental import pallas as pl
from jax.experimental.pallas import tpu as pltpu


def _round_up(x, m):
    return ((x + m - 1) // m) * m


def _qlinear_kernel(params_ref, x_ref, w_ref, b_ref, o_ref, acc_ref,
                    *, quant_act, half_wave, code_dtype):
    """One (i, j, k) grid step of  out = scale * (x_codes @ w_codes) + bias."""
    k = pl.program_id(2)

    @pl.when(k == 0)
    def _init():
        acc_ref[...] = jnp.zeros_like(acc_ref)

    x = x_ref[...]                          # (TM, TK) f32 activations
    if quant_act:
        ar = params_ref[0]                  # activation range (clamp bound)
        inv_sf_a = params_ref[1]            # 1 / scaling_factor  (mul, not div)
        lo = 0.0 if half_wave else -ar
        x = jnp.round(jnp.clip(x, lo, ar) * inv_sf_a)   # integer codes
    xc = x.astype(code_dtype)

    # Weight tile arrives as pre-quantized integer codes, already (K, N) —
    # plain (M,K)@(K,N) on the MXU, f32 accumulation.
    acc_ref[...] += jnp.dot(xc, w_ref[...], preferred_element_type=jnp.float32)

    @pl.when(k == pl.num_programs(2) - 1)
    def _finalize():
        out_scale = params_ref[2]           # sf_a * sf_w  (scalar rescale)
        o_ref[...] = acc_ref[...] * out_scale + b_ref[...]


def qlinear_forward(x, weight, bias, activation_range, *,
                    a_bit=8, w_bit=8, half_wave=True, weight_range=-1.0,
                    tm=128, tn=256, tk=256):
    """Pallas implementation of QLinear.forward (quantized inference path).

    x:      (B, in_features) f32
    weight: (out_features, in_features) f32   (torch.nn.Linear layout)
    bias:   (out_features,) f32 or None
    activation_range: scalar / (1,) f32 (learned clamp bound, init 6.0)
    """
    B, in_f = x.shape
    out_f, in_f2 = weight.shape
    assert in_f == in_f2, "weight / input feature mismatch"

    x = x.astype(jnp.float32)
    weight = weight.astype(jnp.float32)
    if bias is None:
        bias = jnp.zeros((out_f,), jnp.float32)
    bias = bias.astype(jnp.float32)

    eff_a_bit = a_bit if half_wave else a_bit - 1
    quant_act = eff_a_bit > 0
    quant_w = w_bit > 0

    # ---- hoisted weight quantization (static at inference; GLOBAL max) ----
    if quant_w:
        if weight_range is not None and weight_range > 0:
            th = jnp.float32(weight_range)
        else:
            th = jnp.max(jnp.abs(weight))           # weight_range == -1 path
        sf_w = th / (2.0 ** (w_bit - 1) - 1.0)
        w_codes = jnp.round(jnp.clip(weight, -th, th) / sf_w)   # ints in [-(2^(b-1)-1), +...]
    else:
        sf_w = jnp.float32(1.0)
        w_codes = weight

    # bf16 codes are exact for <=8-bit codes; otherwise stay in f32 (still exact).
    use_bf16 = quant_w and quant_act and (w_bit <= 8) and (eff_a_bit <= 8)
    code_dtype = jnp.bfloat16 if use_bf16 else jnp.float32

    w_mat = w_codes.T.astype(code_dtype)            # (in_f, out_f): MXU-preferred layout

    # ---- activation-quant scalars (computed once, passed through SMEM) ----
    ar = jnp.asarray(activation_range, jnp.float32).reshape(())
    if quant_act:
        sf_a = ar / (2.0 ** eff_a_bit - 1.0)
        inv_sf_a = 1.0 / sf_a
    else:
        sf_a = jnp.float32(1.0)
        inv_sf_a = jnp.float32(1.0)
    out_scale = (sf_a * sf_w).astype(jnp.float32)
    params = jnp.stack([ar, inv_sf_a, out_scale]).astype(jnp.float32)   # (3,) in SMEM

    # ---- tile sizes: (8,128)-aligned, lane-dense output, no oversized padding ----
    tm = max(8, min(tm, _round_up(B, 8)))
    tn = max(128, min(tn, _round_up(out_f, 128)))
    tk = max(128, min(tk, _round_up(in_f, 128)))

    Bp = _round_up(B, tm)
    Kp = _round_up(in_f, tk)
    Np = _round_up(out_f, tn)

    xp = jnp.pad(x, ((0, Bp - B), (0, Kp - in_f)))            # zero pad: code 0 -> no effect
    wp = jnp.pad(w_mat, ((0, Kp - in_f), (0, Np - out_f)))
    bp = jnp.pad(bias.reshape(1, out_f), ((0, 0), (0, Np - out_f)))

    grid = (Bp // tm, Np // tn, Kp // tk)

    kernel = functools.partial(
        _qlinear_kernel,
        quant_act=quant_act, half_wave=half_wave, code_dtype=code_dtype,
    )

    out_padded = pl.pallas_call(
        kernel,
        out_shape=jax.ShapeDtypeStruct((Bp, Np), jnp.float32),
        grid_spec=pltpu.PrefetchScalarGridSpec(
            num_scalar_prefetch=0,
            grid=grid,
            in_specs=[
                pl.BlockSpec(memory_space=pltpu.MemorySpace.SMEM),      # params (3,)
                pl.BlockSpec((tm, tk), lambda i, j, k: (i, k)),         # x
                pl.BlockSpec((tk, tn), lambda i, j, k: (k, j)),         # W codes (K,N)
                pl.BlockSpec((1, tn), lambda i, j, k: (0, j)),          # bias
            ],
            out_specs=pl.BlockSpec((tm, tn), lambda i, j, k: (i, j)),
            scratch_shapes=[pltpu.VMEM((tm, tn), jnp.float32)],
        ),
        compiler_params=pltpu.CompilerParams(
            dimension_semantics=("parallel", "parallel", "arbitrary"),
        ),
    )(params, xp, wp, bp)

    return out_padded[:B, :out_f]


def _reference(x, weight, bias, ar, *, a_bit=8, w_bit=8, half_wave=True):
    """Pure-JAX reference of the original module math (dequant-then-dot)."""
    eff_a_bit = a_bit if half_wave else a_bit - 1
    if half_wave:
        ori_x = 0.5 * (jnp.abs(x) - jnp.abs(x - ar) + ar)
    else:
        ori_x = 0.5 * (jnp.abs(-x - ar) - jnp.abs(x - ar))
    sf_a = ar / (2.0 ** eff_a_bit - 1.0)
    xq = jnp.round(ori_x / sf_a) * sf_a
    th = jnp.max(jnp.abs(weight))
    sf_w = th / (2.0 ** (w_bit - 1) - 1.0)
    wq = jnp.round(jnp.clip(weight, -th, th) / sf_w) * sf_w
    return xq @ wq.T + bias


if __name__ == "__main__":
    # Small shapes consistent with QLinear(in_features=32, out_features=16)
    B, IN_F, OUT_F = 8, 32, 16
    key = jax.random.PRNGKey(0)
    kx, kw, kb = jax.random.split(key, 3)

    # reset_parameters(): kaiming_uniform_(a=sqrt(5)) -> U(-1/sqrt(fan_in), 1/sqrt(fan_in))
    bound = 1.0 / math.sqrt(IN_F)
    weight = jax.random.uniform(kw, (OUT_F, IN_F), jnp.float32, -bound, bound)
    bias = jax.random.uniform(kb, (OUT_F,), jnp.float32, -bound, bound)
    activation_range = jnp.array([6.0], jnp.float32)   # init_range = 6.0

    x = jax.random.normal(kx, (B, IN_F), jnp.float32) * 2.0

    out = qlinear_forward(x, weight, bias, activation_range,
                          a_bit=8, w_bit=8, half_wave=True)
    out = jax.block_until_ready(out)

    ref = _reference(x, weight, bias, activation_range[0],
                     a_bit=8, w_bit=8, half_wave=True)
    assert out.shape == (B, OUT_F)
    assert jnp.allclose(out, ref, atol=1e-4, rtol=1e-4), "mismatch vs JAX reference"

    print("KERNEL_OK")
</pallas_src>

<mosaic_0001>
module attributes {stable_mosaic.version = 11 : i64} {
  func.func @_qlinear_kernel(%arg0: i32, %arg1: i32, %arg2: i32, %arg3: memref<3xf32, #tpu.memory_space<smem>>, %arg4: memref<8x128xf32, #tpu.memory_space<vmem>>, %arg5: memref<128x128xbf16, #tpu.memory_space<vmem>>, %arg6: memref<1x128xf32, #tpu.memory_space<vmem>>, %arg7: memref<8x128xf32, #tpu.memory_space<vmem>>, %arg8: memref<8x128xf32, #tpu.memory_space<vmem>>) attributes {dimension_semantics = [#tpu.dimension_semantics<parallel>, #tpu.dimension_semantics<parallel>, #tpu.dimension_semantics<arbitrary>], iteration_bounds = array<i64: 1, 1, 1>, scalar_prefetch = 0 : i64, scratch_operands = 1 : i64, tpu.core_type = #tpu.core_type<tc>, window_params = [{transform_indices = @transform_0, window_bounds = array<i64: 3>}, {transform_indices = @transform_1, window_bounds = array<i64: 8, 128>}, {transform_indices = @transform_2, window_bounds = array<i64: 128, 128>}, {transform_indices = @transform_3, window_bounds = array<i64: 1, 128>}, {transform_indices = @transform_4, window_bounds = array<i64: 8, 128>}]} {
    %c0_i32 = arith.constant 0 : i32
    %0 = arith.cmpi eq, %arg2, %c0_i32 : i32
    %1 = arith.extui %0 : i1 to i32
    %c0_i32_0 = arith.constant 0 : i32
    %2 = arith.cmpi ne, %1, %c0_i32_0 : i32
    scf.if %2 {
      %cst_12 = arith.constant 0.000000e+00 : f32
      %22 = vector.broadcast %cst_12 : f32 to vector<8x128xf32>
      %c0_13 = arith.constant 0 : index
      %c0_14 = arith.constant 0 : index
      %23 = vector.load %arg8[%c0_13, %c0_14] : memref<8x128xf32, #tpu.memory_space<vmem>>, vector<8x128xf32>
      tpu.vector_store %arg8[%c0_13, %c0_14], %22 {strides = array<i32>} : memref<8x128xf32, #tpu.memory_space<vmem>>, vector<8x128xf32>,
    } else {
    }
    %c0 = arith.constant 0 : index
    %c0_1 = arith.constant 0 : index
    %3 = vector.load %arg4[%c0, %c0_1] : memref<8x128xf32, #tpu.memory_space<vmem>>, vector<8x128xf32>
    %c0_2 = arith.constant 0 : index
    %4 = memref.load %arg3[%c0_2] : memref<3xf32, #tpu.memory_space<smem>>
    %c1 = arith.constant 1 : index
    %5 = memref.load %arg3[%c1] : memref<3xf32, #tpu.memory_space<smem>>
    %cst = arith.constant 0.000000e+00 : f32
    %6 = vector.broadcast %cst : f32 to vector<8x128xf32>
    %7 = arith.maximumf %6, %3 : vector<8x128xf32>
    %8 = vector.broadcast %4 : f32 to vector<8x128xf32>
    %9 = arith.minimumf %8, %7 : vector<8x128xf32>
    %10 = vector.broadcast %5 : f32 to vector<8x128xf32>
    %11 = arith.mulf %9, %10 : vector<8x128xf32>
    %12 = math.roundeven %11 : vector<8x128xf32>
    %13 = arith.truncf %12 : vector<8x128xf32> to vector<8x128xbf16>
    %c0_3 = arith.constant 0 : index
    %c0_4 = arith.constant 0 : index
    %14 = vector.load %arg8[%c0_3, %c0_4] : memref<8x128xf32, #tpu.memory_space<vmem>>, vector<8x128xf32>
    %c0_5 = arith.constant 0 : index
    %c0_6 = arith.constant 0 : index
    %15 = vector.load %arg5[%c0_5, %c0_6] : memref<128x128xbf16, #tpu.memory_space<vmem>>, vector<128x128xbf16>
    %cst_7 = arith.constant dense<0.000000e+00> : vector<8x128xf32>
    %16 = tpu.matmul %13, %15, %cst_7 {dimension_numbers = #tpu.dot_dimension_numbers<[1], [0], [0], [1], [0, 0, 1, 1], [], []>} : vector<8x128xbf16>, vector<128x128xbf16>, vector<8x128xf32> -> vector<8x128xf32>
    %17 = arith.addf %14, %16 : vector<8x128xf32>
    %c0_8 = arith.constant 0 : index
    %c0_9 = arith.constant 0 : index
    %18 = vector.load %arg8[%c0_8, %c0_9] : memref<8x128xf32, #tpu.memory_space<vmem>>, vector<8x128xf32>
    tpu.vector_store %arg8[%c0_8, %c0_9], %17 {strides = array<i32>} : memref<8x128xf32, #tpu.memory_space<vmem>>, vector<8x128xf32>,
    %c0_i32_10 = arith.constant 0 : i32
    %19 = arith.cmpi eq, %arg2, %c0_i32_10 : i32
    %20 = arith.extui %19 : i1 to i32
    %c0_i32_11 = arith.constant 0 : i32
    %21 = arith.cmpi ne, %20, %c0_i32_11 : i32
    scf.if %21 {
      %c2 = arith.constant 2 : index
      %22 = memref.load %arg3[%c2] : memref<3xf32, #tpu.memory_space<smem>>
      %c0_12 = arith.constant 0 : index
      %c0_13 = arith.constant 0 : index
      %23 = vector.load %arg8[%c0_12, %c0_13] : memref<8x128xf32, #tpu.memory_space<vmem>>, vector<8x128xf32>
      %24 = vector.broadcast %22 : f32 to vector<8x128xf32>
      %25 = arith.mulf %23, %24 : vector<8x128xf32>
      %c0_14 = arith.constant 0 : index
      %c0_15 = arith.constant 0 : index
      %26 = vector.load %arg6[%c0_14, %c0_15] : memref<1x128xf32, #tpu.memory_space<vmem>>, vector<1x128xf32>
      %27 = vector.broadcast %26 : vector<1x128xf32> to vector<8x128xf32>
      %28 = arith.addf %25, %27 : vector<8x128xf32>
      %c0_16 = arith.constant 0 : index
      %c0_17 = arith.constant 0 : index
      %29 = vector.load %arg7[%c0_16, %c0_17] : memref<8x128xf32, #tpu.memory_space<vmem>>, vector<8x128xf32>
      tpu.vector_store %arg7[%c0_16, %c0_17], %28 {strides = array<i32>} : memref<8x128xf32, #tpu.memory_space<vmem>>, vector<8x128xf32>,
    } else {
    }
    return
  }
  func.func @transform_0(%arg0: i32, %arg1: i32, %arg2: i32) -> i32 {
    %c0_i32 = arith.constant 0 : i32
    %c0_i32_0 = arith.constant 0 : i32
    return %c0_i32 : i32
  }
  func.func @transform_1(%arg0: i32, %arg1: i32, %arg2: i32) -> (i32, i32) {
    %c0_i32 = arith.constant 0 : i32
    return %arg0, %arg2 : i32, i32
  }
  func.func @transform_2(%arg0: i32, %arg1: i32, %arg2: i32) -> (i32, i32) {
    %c0_i32 = arith.constant 0 : i32
    return %arg2, %arg1 : i32, i32
  }
  func.func @transform_3(%arg0: i32, %arg1: i32, %arg2: i32) -> (i32, i32) {
    %c0_i32 = arith.constant 0 : i32
    %c0_i32_0 = arith.constant 0 : i32
    return %c0_i32, %arg1 : i32, i32
  }
  func.func @transform_4(%arg0: i32, %arg1: i32, %arg2: i32) -> (i32, i32) {
    %c0_i32 = arith.constant 0 : i32
    return %arg0, %arg1 : i32, i32
  }
}

</mosaic_0001>

<bundles_post_ra>
// kernel: tpu_custom_call.1
= control target key start
LH: loop header
LB: loop body
LE: loop exit
PB: predicated region body
PF: predicated region fallthrough
CT: control target
= control target key end

     0   :  { %9 = vsyncpa [#allocation6], 0  ;;  %s436_s0 = inlined_call_operand.hbm [shape: f32[3], index: 0, kind: input, shape index: {}]   ;;  %s437_s1 = inlined_call_operand.hbm [shape: f32[8,128], index: 1, kind: input, shape index: {}]   ;;  %s438_s2 = inlined_call_operand.hbm [shape: bf16[128,128], index: 2, kind: input, shape index: {}]   ;;  %s439_s3 = inlined_call_operand.vmem [shape: f32[1,128], index: 3, kind: input, shape index: {}]   ;;  %s440_s4 = inlined_call_operand.hbm [shape: f32[8,128], index: 4, kind: output, shape index: {}]  }
   0x1   :  { %10 = vsyncpa [#allocation4], 0 }
   0x2   :  { %11 = vsyncpa [#allocation9], 0 }
   0x3   :  { %12 = vsyncpa [#allocation5], 0  ;;  %s268_s17 = scalar_lea.hbm %s436_s0, 16 }
   0x4   :  { %p269_p0 = scmp.ne.s32.totalorder %s436_s0, %s268_s17  ;;  %p272_p1 = scmp.lt.u32.totalorder %s268_s17, %s436_s0 }
   0x6   :  { %p274_p2 = pnand %p272_p1, %p269_p0 }
   0x8   :  { %277 = shalt.err (!%p274_p2)
}
   0x9   :  { %s352_s22 = smov [#allocation3]   ;;  %s353_s25 = smov [#allocation7]  }
   0xa   :  { %20 = dma.hbm_to_smem %s436_s0, 16, %s352_s22, [#allocation6]  }
   0xb   :  { %s27_s26 = sshll.u32 %s353_s25, 4  ;;  %s354_s27 = smov [#allocation8]   ;;  %s28_s26 = int_to_ptr.vmem [resolvable:$true] %s27_s26 }
   0xc   :  { %s36_s28 = sshll.u32 %s354_s27, 4  ;;  %s278_s5 = scalar_lea.hbm %s437_s1, 128  ;;  %s37_s28 = int_to_ptr.vmem [resolvable:$true] %s36_s28 }
   0xd   :  { %p279_p3 = scmp.ne.s32.totalorder %s437_s1, %s278_s5  ;;  %p282_p4 = scmp.lt.u32.totalorder %s278_s5, %s437_s1 }
   0xf   :  { %p284_p5 = pnand %p282_p4, %p279_p3 }
  0x11   :  { %287 = shalt.err (!%p284_p5)
}
  0x12   :  { %s288_s0 = scalar_lea.vmem %s28_s26, 128  ;;  %p293_p7 = scmp.lt.s32.totalorder %s28_s26, %s28_s26 }
  0x13   :  { %p289_p6 = scmp.ne.s32.totalorder %s28_s26, %s288_s0  ;;  %p294_p8 = scmp.lt.s32.totalorder %s288_s0, %s288_s0 }
  0x15   :  { %p295_p9 = por %p294_p8, %p293_p7 }
  0x17   :  { %p296_p10 = pnand %p295_p9, %p289_p6 }
  0x19   :  { %299 = shalt.err (!%p296_p10)
}
  0x1a   :  { %30 = dma.hbm_to_vmem [thread:$0]  %s437_s1, 128, %s28_s26, [#allocation4]  }
  0x1b   :  { %s300_s14 = scalar_lea.hbm %s438_s2, 1024 }
  0x1c   :  { %p301_p11 = scmp.ne.s32.totalorder %s438_s2, %s300_s14  ;;  %p304_p12 = scmp.lt.u32.totalorder %s300_s14, %s438_s2 }
  0x1e   :  { %p306_p13 = pnand %p304_p12, %p301_p11 }
  0x20   :  { %309 = shalt.err (!%p306_p13)
}
  0x21   :  { %s310_s19 = scalar_lea.vmem %s37_s28, 1024  ;;  %p315_p1 = scmp.lt.s32.totalorder %s37_s28, %s37_s28 }
  0x22   :  { %p311_p0 = scmp.ne.s32.totalorder %s37_s28, %s310_s19  ;;  %p316_p2 = scmp.lt.s32.totalorder %s310_s19, %s310_s19 }
  0x24   :  { %p317_p3 = por %p316_p2, %p315_p1 }
  0x26   :  { %p318_p4 = pnand %p317_p3, %p311_p0 }
  0x28   :  { %321 = shalt.err (!%p318_p4)
}
  0x29   :  { %s355_s1 = smov 64   ;;  %s356_s20 = smov 4  }
  0x2a   :  { %42 = dma.hbm_to_vmem [thread:$0]  %s438_s2, 1024, %s37_s28, [#allocation9], %s355_s1, %s355_s1, %s356_s20  }
  0x2b   :  { %344 = dma.done.wait [#allocation6], 16  }
  0x2c   :  { %345 = vsyncadd [#allocation6], 4294967280 }
  0x2d   :  { %346 = dma.done.wait [#allocation4], 128  }
  0x2e   :  { %347 = vsyncadd [#allocation4], 4294967168 }
  0x2f   :  { %348 = dma.done.wait [#allocation9], 1024  }
  0x30   :  { %349 = vsyncadd [#allocation9], 4294966272 }
  0x31   :  { %54 = sfence }
  0x32   :  { %v260_v0 = vld [vmem:[#allocation8] sm:$0xff]   ;;  %v357_v1 = vmov 0.0   ;;  %v261_v2 = vld [vmem:[#allocation8 + $0x8] sm:$0xff]   ;;  %vm358_vm0 = vmmov 0   ;;  %v262_v3 = vld [vmem:[#allocation8 + $0x10] sm:$0xff]   ;;  %s62_s23 = sld [smem:[#allocation3]] }
  0x33   :  { %231 = vmatprep.subr.bf16.mxu0 %v357_v1  ;;  %247 = vmatprep.mubr.msk.bf16.mxu0 %vm358_vm0, %v357_v1  ;;  %v263_v4 = vld [vmem:[#allocation8 + $0x18] sm:$0xff]   ;;  %s211_s2 = sld [smem:[#allocation3 + $0x1]]  ;;  %v264_v7 = vld [vmem:[#allocation8 + $0x20] sm:$0xff]   ;;  %v265_v10 = vld [vmem:[#allocation8 + $0x28] sm:$0xff]   ;;  %s220_s24 = sld [smem:[#allocation3 + $0x2]] }
  0x34   :  { %232 = vmatpush3.bf16.msra.mxu0 %v260_v0  ;;  %v61_v5 = vld [vmem:[#allocation7] sm:$0xff]  ;;  %v266_v13 = vld [vmem:[#allocation8 + $0x30] sm:$0xff]   ;;  %s359_s27 = smov [#allocation10]  }
  0x35   :  { %233 = vmatprep.subr.bf16.mxu0 %v357_v1  ;;  %v64_v6 = vmax.f32 %v61_v5, 0.0  ;;  %v267_v15 = vld [vmem:[#allocation8 + $0x38] sm:$0xff]   ;;  %s200_s28 = sshll.u32 %s359_s27, 4  ;;  %s201_s28 = int_to_ptr.vmem [resolvable:$true] %s200_s28 }
  0x36   :  { %v221_v19 = vld [vmem:[%s439_s3] ss:$0 sm:$0xff]  ;;  %s322_s29 = scalar_lea.vmem %s201_s28, 128  ;;  %p327_p6 = scmp.lt.s32.totalorder %s201_s28, %s201_s28 }
  0x37   :  { %p323_p5 = scmp.ne.s32.totalorder %s201_s28, %s322_s29  ;;  %p328_p7 = scmp.lt.s32.totalorder %s322_s29, %s322_s29 }
  0x38   :  { %234 = vmatpush3.bf16.msra.mxu0 %v261_v2  ;;  %v65_v8 = vstv %s62_s23 }
  0x39   :  { %235 = vmatprep.subr.bf16.mxu0 %v357_v1  ;;  %v66_v9 = vmin.f32 %v65_v8, %v64_v6  ;;  %v67_v11 = vstv %s211_s2  ;;  %v183_v17 = vstv %s220_s24  ;;  %p329_p8 = por %p328_p7, %p327_p6 }
  0x3b   :  { %v68_v12 = vmul.f32 %v67_v11, %v66_v9  ;;  %p330_p9 = pnand %p329_p8, %p323_p5 }
  0x3c   :  { %236 = vmatpush3.bf16.msra.mxu0 %v262_v3 }
  0x3d   :  { %237 = vmatprep.subr.bf16.mxu0 %v357_v1  ;;  %v251_v14 = vround.rtne.f32 %v68_v12 }
  0x3f   :  { %v70_v16 = vpack.c.bf16 %v251_v14, %v251_v14 }
  0x40   :  { %238 = vmatpush3.bf16.msra.mxu0 %v263_v4 }
  0x41   :  { %239 = vmatprep.subr.bf16.mxu0 %v357_v1 }
  0x44   :  { %240 = vmatpush3.bf16.msra.mxu0 %v264_v7 }
  0x45   :  { %241 = vmatprep.subr.bf16.mxu0 %v357_v1 }
  0x48   :  { %242 = vmatpush3.bf16.msra.mxu0 %v265_v10 }
  0x49   :  { %243 = vmatprep.subr.bf16.mxu0 %v357_v1 }
  0x4c   :  { %244 = vmatpush3.bf16.msra.mxu0 %v266_v13 }
  0x4d   :  { %245 = vmatprep.subr.bf16.mxu0 %v357_v1 }
  0x50   :  { %246 = vmatpush3.bf16.msra.mxu0 %v267_v15 }
  0x53   :  { %248 = vmatmul.mubr.bf16.vlgmr.msra.gmra.mrb[0].mxu0 %v70_v16 }
 0x126   :  { %v170_v18 = vpop.f32.mrb[0].mxu0 }
 0x127   :  { %v184_v20 = vmul.f32 %v183_v17, %v170_v18  ;;  %v249_v21 = vpop.f32.mrb[1].mxu0 }
 0x128   :  { %v173_v22 = vpop.f32.mrb[2].mxu0 }
 0x129   :  { %v250_v23 = vpop.f32.mrb[3].mxu0  ;;  %v192_v24 = vadd.f32 %v221_v19, %v184_v20 }
 0x12b   :  { %193 = vst [vmem:[#allocation10] sm:$0xff] %v192_v24 }
 0x12c   :  { %333 = shalt.err (!%p330_p9)
}
 0x12d   :  { %s334_s3 = scalar_lea.hbm %s440_s4, 128 }
 0x12e   :  { %p335_p10 = scmp.ne.s32.totalorder %s440_s4, %s334_s3  ;;  %p338_p11 = scmp.lt.u32.totalorder %s334_s3, %s440_s4 }
 0x130   :  { %p340_p12 = pnand %p338_p11, %p335_p10 }
 0x132   :  { %343 = shalt.err (!%p340_p12)
}
 0x133   :  { %203 = dma.vmem_to_hbm [thread:$0]  %s201_s28, 128, %s440_s4, [#allocation5]  }
 0x134   :  { %350 = dma.done.wait [#allocation5], 128  }
 0x135   :  { %351 = vsyncadd [#allocation5], 4294967168 }
 0x136   :  { %207 = vsyncpa [#allocation4], 1 }
 0x137   :  { %208 = vsyncpa [#allocation9], 1 }
 0x138   :  { %209 = vsyncpa [#allocation5], 1 }
 0x139   :  { %210 = vsyncpa [#allocation6], 1 }

</bundles_post_ra>
